<compile_context>
chip_gen: v7x
topology: tpu7x:2x2x1
jax: 0.10.0
libtpu: 0.0.40
codegen_flags: <defaults>
</compile_context>

<pallas_src>
import jax
import jax.numpy as jnp
from jax.experimental import pallas as pl
from jax.experimental.pallas import tpu as pltpu


def _value_head_kernel(x_ref, w_ref, b_ref, o_ref):
    # x_ref: (tm, H) VMEM tile of flattened hidden states
    # w_ref: (1, H)  VMEM lane-major weight (f32, broadcast over rows)
    # b_ref: (1,)    SMEM scalar bias (f32)
    # o_ref: (1, tm) VMEM lane-dense output slab for this tile
    x = x_ref[...].astype(jnp.float32)
    w = w_ref[...]
    # VPU multiply + cross-lane (XLU) reduction; f32 accumulation.
    acc = jnp.sum(x * w, axis=-1) + b_ref[0]            # (tm,), f32
    o_ref[...] = acc.reshape(1, -1).astype(o_ref.dtype)


def _vmem_budgets():
    """Generation-aware (input_budget_bytes, vmem_limit_cap_bytes)."""
    cap_phys = None
    try:
        info = pltpu.get_tpu_info()
        cap_phys = getattr(info, "vmem_capacity_bytes", None)
    except Exception:
        cap_phys = None
    if cap_phys is None:
        cap_phys = 64 << 20                      # conservative (v7x-sized) fallback
    if cap_phys <= (64 << 20):                   # v7x: 64 MiB VMEM per TensorCore
        return 36 << 20, 48 << 20
    return 96 << 20, 112 << 20                   # v5e / v6e: 128 MiB VMEM


def _pick_row_tile(M, H, itemsize, input_budget, target_per_buf=12 << 20):
    """Byte-targeted row tile: ~target_per_buf per input buffer, clamped so
    double-buffered input + a possible f32 intermediate fit the VMEM budget,
    rounded to 128 rows (covers bf16 sublane packing and lane-dense output),
    and split so the grid has >=2 steps when the problem allows it."""
    align = 128
    bytes_per_row = H * itemsize
    by_target = max(1, target_per_buf // bytes_per_row)
    by_vmem = max(1, input_budget // (2 * bytes_per_row + 4 * H))
    tm = max(align, (min(by_target, by_vmem) // align) * align)

    m_rounded = pl.cdiv(M, align) * align
    tm = min(tm, m_rounded)

    # Guarantee >=2 grid steps when possible so v7x's second TensorCore
    # (fed via the "parallel" grid axis) is not idle.
    if m_rounded >= 2 * align and pl.cdiv(M, tm) < 2:
        tm = pl.cdiv(m_rounded // align, 2) * align
    return int(tm)


def value_head_forward(hidden_states, weight, bias, *, tm=None):
    """hidden_states: [B, S, H]; weight: [H, 1] (or [H]/[1, H]); bias: [1].

    Returns value estimates [B, S] in hidden_states.dtype.
    """
    B, S, H = hidden_states.shape
    M = B * S
    dtype = hidden_states.dtype
    itemsize = jnp.dtype(dtype).itemsize

    input_budget, vmem_cap = _vmem_budgets()
    if tm is None:
        tm = _pick_row_tile(M, H, itemsize, input_budget)
    assert tm % 128 == 0, "row tile must be a multiple of 128"

    num_tiles = int(pl.cdiv(M, tm))

    # No jnp.pad: Pallas handles the partial last block; out-of-bounds rows of
    # the last tile hold unspecified data and are sliced off below with [:M].
    x2d = hidden_states.reshape(M, H)
    w_lane = weight.reshape(1, H).astype(jnp.float32)    # lane-major weight
    b_smem = bias.reshape(1).astype(jnp.float32)         # scalar bias -> SMEM

    vmem_limit = int(min(
        max(
            2 * tm * H * itemsize        # double-buffered input tiles
            + tm * H * 4                 # insurance: possible f32 upcast intermediate
            + 2 * tm * itemsize          # double-buffered (1, tm) output slab
            + 2 * H * 4                  # resident (1, H) f32 weight (x2 buffers)
            + (4 << 20),                 # Mosaic internal scratch headroom
            16 << 20,                    # safe floor
        ),
        vmem_cap,                        # generation-aware cap (48 MiB on v7x)
    ))

    out = pl.pallas_call(
        _value_head_kernel,
        out_shape=jax.ShapeDtypeStruct((num_tiles, tm), dtype),
        grid_spec=pltpu.PrefetchScalarGridSpec(
            num_scalar_prefetch=0,
            grid=(num_tiles,),
            in_specs=[
                pl.BlockSpec((tm, H), lambda i: (i, 0)),            # row tile
                pl.BlockSpec((1, H), lambda i: (0, 0)),             # full weight
                pl.BlockSpec(memory_space=pltpu.MemorySpace.SMEM),  # bias scalar
            ],
            out_specs=pl.BlockSpec((1, tm), lambda i: (i, 0)),      # lane-dense
        ),
        compiler_params=pltpu.CompilerParams(
            dimension_semantics=("parallel",),   # shards tiles across TCs (v7x)
            vmem_limit_bytes=vmem_limit,
        ),
    )(x2d, w_lane, b_smem)

    return out.reshape(num_tiles * tm)[:M].reshape(B, S)


def _reference(hidden_states, weight, bias):
    # Pure-elementwise f32 reference (avoids MXU default-precision surprises).
    B, S, H = hidden_states.shape
    x = hidden_states.reshape(B * S, H).astype(jnp.float32)
    w = weight.reshape(1, H).astype(jnp.float32)
    return (jnp.sum(x * w, axis=-1) + bias.reshape(()).astype(jnp.float32)
            ).reshape(B, S).astype(hidden_states.dtype)


if __name__ == "__main__":
    # Small shapes consistent with the module: batch=2, seq=8, hidden=32.
    B, S, H = 2, 8, 32

    key = jax.random.PRNGKey(0)
    k_x, k_w, k_b = jax.random.split(key, 3)

    hidden_states = jax.random.normal(k_x, (B, S, H), dtype=jnp.float32)
    # nn.Linear(hidden_size, 1): weight stored here as [H, 1], bias [1].
    weight = (jax.random.normal(k_w, (H, 1), dtype=jnp.float32)
              * (1.0 / jnp.sqrt(H)))
    bias = jax.random.normal(k_b, (1,), dtype=jnp.float32) * 0.01

    values = jax.block_until_ready(value_head_forward(hidden_states, weight, bias))
    ref = _reference(hidden_states, weight, bias)
    assert values.shape == (B, S)
    assert jnp.allclose(values, ref, atol=1e-5, rtol=1e-5)

    # Ragged-tail path (B*S not a multiple of the row tile; no wrapper pad).
    B2, S2 = 3, 5
    hs2 = jax.random.normal(k_x, (B2, S2, H), dtype=jnp.float32)
    v2 = jax.block_until_ready(value_head_forward(hs2, weight, bias))
    ref2 = _reference(hs2, weight, bias)
    assert v2.shape == (B2, S2)
    assert jnp.allclose(v2, ref2, atol=1e-5, rtol=1e-5)

    # Non-128-multiple hidden size: lane-padded region of the (tm, H) block
    # must not contaminate the axis=-1 reduction.
    H3 = 160
    k3x, k3w, k3b = jax.random.split(jax.random.PRNGKey(0), 3)
    hs3 = jax.random.normal(k3x, (B, S, H3), dtype=jnp.float32)
    w3 = jax.random.normal(k3w, (H3, 1), dtype=jnp.float32) * (1.0 / jnp.sqrt(H3))
    b3 = jax.random.normal(k3b, (1,), dtype=jnp.float32) * 0.01
    v3 = jax.block_until_ready(value_head_forward(hs3, w3, b3))
    ref3 = _reference(hs3, w3, b3)
    assert v3.shape == (B, S)
    assert jnp.allclose(v3, ref3, atol=1e-4, rtol=1e-4)

    print("KERNEL_OK")
</pallas_src>

<mosaic_0001>
module attributes {stable_mosaic.version = 11 : i64} {
  func.func @_value_head_kernel(%arg0: i32, %arg1: memref<128x32xf32, #tpu.memory_space<vmem>>, %arg2: memref<1x32xf32, #tpu.memory_space<vmem>>, %arg3: memref<1xf32, #tpu.memory_space<smem>>, %arg4: memref<1x128xf32, #tpu.memory_space<vmem>>) attributes {dimension_semantics = [#tpu.dimension_semantics<parallel>], iteration_bounds = array<i64: 1>, scalar_prefetch = 0 : i64, scratch_operands = 0 : i64, tpu.core_type = #tpu.core_type<tc>, window_params = [{transform_indices = @transform_0, window_bounds = array<i64: 128, 32>}, {pipeline_mode = #tpu.pipeline_mode<synchronous>, transform_indices = @transform_1, window_bounds = array<i64: 1, 32>}, {transform_indices = @transform_2, window_bounds = array<i64: 1>}, {transform_indices = @transform_3, window_bounds = array<i64: 1, 128>}]} {
    %c0 = arith.constant 0 : index
    %c0_0 = arith.constant 0 : index
    %0 = vector.load %arg1[%c0, %c0_0] : memref<128x32xf32, #tpu.memory_space<vmem>>, vector<128x32xf32>
    %c0_1 = arith.constant 0 : index
    %c0_2 = arith.constant 0 : index
    %1 = vector.load %arg2[%c0_1, %c0_2] : memref<1x32xf32, #tpu.memory_space<vmem>>, vector<1x32xf32>
    %2 = vector.broadcast %1 : vector<1x32xf32> to vector<128x32xf32>
    %3 = arith.mulf %0, %2 : vector<128x32xf32>
    %cst = arith.constant dense<0.000000e+00> : vector<128xf32>
    %4 = vector.multi_reduction <add>, %3, %cst [1] : vector<128x32xf32> to vector<128xf32>
    %c0_3 = arith.constant 0 : index
    %5 = memref.load %arg3[%c0_3] : memref<1xf32, #tpu.memory_space<smem>>
    %6 = vector.broadcast %5 : f32 to vector<128xf32>
    %7 = arith.addf %4, %6 : vector<128xf32>
    %8 = vector.shape_cast %7 : vector<128xf32> to vector<1x128xf32>
    %c0_4 = arith.constant 0 : index
    %c0_5 = arith.constant 0 : index
    %9 = vector.load %arg4[%c0_4, %c0_5] : memref<1x128xf32, #tpu.memory_space<vmem>>, vector<1x128xf32>
    tpu.vector_store %arg4[%c0_4, %c0_5], %8 {strides = array<i32>} : memref<1x128xf32, #tpu.memory_space<vmem>>, vector<1x128xf32>,
    return
  }
  func.func @transform_0(%arg0: i32) -> (i32, i32) {
    %c0_i32 = arith.constant 0 : i32
    %c0_i32_0 = arith.constant 0 : i32
    return %arg0, %c0_i32 : i32, i32
  }
  func.func @transform_1(%arg0: i32) -> (i32, i32) {
    %c0_i32 = arith.constant 0 : i32
    %c0_i32_0 = arith.constant 0 : i32
    %c0_i32_1 = arith.constant 0 : i32
    return %c0_i32, %c0_i32_0 : i32, i32
  }
  func.func @transform_2(%arg0: i32) -> i32 {
    %c0_i32 = arith.constant 0 : i32
    %c0_i32_0 = arith.constant 0 : i32
    return %c0_i32 : i32
  }
  func.func @transform_3(%arg0: i32) -> (i32, i32) {
    %c0_i32 = arith.constant 0 : i32
    %c0_i32_0 = arith.constant 0 : i32
    return %arg0, %c0_i32 : i32, i32
  }
}

</mosaic_0001>

<bundles_post_ra>
// kernel: tpu_custom_call.1
= control target key start
LH: loop header
LB: loop body
LE: loop exit
PB: predicated region body
PF: predicated region fallthrough
CT: control target
= control target key end

     0   :  { %9 = vsyncpa [#allocation4], 0  ;;  %s457_s0 = inlined_call_operand.hbm [shape: f32[16,32], index: 0, kind: input, shape index: {}]   ;;  %s458_s1 = inlined_call_operand.vmem [shape: f32[1,32], index: 1, kind: input, shape index: {}]   ;;  %s459_s2 = inlined_call_operand.<no memory space> [shape: f32[1], index: 2, kind: input, shape index: {}]   ;;  %s460_s3 = inlined_call_operand.hbm [shape: f32[1,128], index: 3, kind: output, shape index: {}]  }
   0x1   :  { %10 = vsyncpa [#allocation5], 0 }
   0x2   :  { %15 = vsyncadd [#allocation4], 1792  ;;  %s333_s12 = smov [#allocation3]   ;;  %s285_s16 = scalar_lea.hbm %s457_s0, 256 }
   0x3   :  { %s16_s13 = sshll.u32 %s333_s12, 4  ;;  %p286_p0 = scmp.ne.s32.totalorder %s457_s0, %s285_s16  ;;  %s17_s13 = int_to_ptr.vmem [resolvable:$true] %s16_s13 }
   0x4   :  { %p289_p1 = scmp.lt.u32.totalorder %s285_s16, %s457_s0 }
   0x6   :  { %p291_p2 = pnand %p289_p1, %p286_p0 }
   0x8   :  { %294 = shalt.err (!%p291_p2)
}
   0x9   :  { %s295_s21 = scalar_lea.vmem %s17_s13, 256  ;;  %s299_s22 = scalar_lea.vmem %s17_s13, 2048 }
   0xa   :  { %p296_p3 = scmp.ne.s32.totalorder %s17_s13, %s295_s21  ;;  %p300_p4 = scmp.lt.s32.totalorder %s17_s13, %s17_s13 }
   0xb   :  { %p301_p5 = scmp.lt.s32.totalorder %s299_s22, %s295_s21 }
   0xd   :  { %p302_p6 = por %p301_p5, %p300_p4 }
   0xf   :  { %p303_p7 = pnand %p302_p6, %p296_p3 }
  0x11   :  { %306 = shalt.err (!%p303_p7)
}
  0x12   :  { %s334_s23 = smov 128   ;;  %s335_s24 = smov 8  }
  0x13   :  { %22 = dma.hbm_to_vmem [thread:$0]  %s457_s0, 256, %s17_s13, [#allocation4], %s334_s23, %s334_s23, %s335_s24  }
  0x14   :  { %329 = dma.done.wait [#allocation4], 2048  }
  0x15   :  { %330 = vsyncadd [#allocation4], 4294965248  ;;  %v30_v0 = vld [vmem:[#allocation3] sm:$0xff]  ;;  %vm69_vm0 = vcmask 261120   ;;  %v32_v2 = vld [vmem:[#allocation3 + $0x10] sm:$0xff]  ;;  %v152_v49 = vlaneseq  ;;  %v397_v54 = vstv %s459_s2  ;;  %vm163_vm1 = vcmask 130112  }
  0x16   :  { %v280_v1 = vld [vmem:[%s458_s1] ss:$0 sm:$0xff]  ;;  %v31_v5 = vld [vmem:[#allocation3 + $0x8] sm:$0xff]  ;;  %v33_v6 = vld [vmem:[#allocation3 + $0x18] sm:$0xff]  ;;  %vm170_vm2 = vcmask 195712   ;;  %vm177_vm3 = vcmask 261312  }
  0x17   :  { %v53_v3 = vmul.f32 %v280_v1, %v30_v0  ;;  %v55_v4 = vmul.f32 %v280_v1, %v32_v2  ;;  %v54_v7 = vmul.f32 %v280_v1, %v31_v5  ;;  %v56_v8 = vmul.f32 %v280_v1, %v33_v6  ;;  %v34_v9 = vld [vmem:[#allocation3 + $0x20] sm:$0xff]  ;;  %v35_v10 = vld [vmem:[#allocation3 + $0x28] sm:$0xff]  ;;  %v36_v17 = vld [vmem:[#allocation3 + $0x30] sm:$0xff]  ;;  %s336_s2 = smov [#allocation6]  }
  0x18   :  { %v57_v15 = vmul.f32 %v280_v1, %v34_v9  ;;  %v58_v16 = vmul.f32 %v280_v1, %v35_v10  ;;  %v37_v18 = vld [vmem:[#allocation3 + $0x38] sm:$0xff]  ;;  %v59_v21 = vmul.f32 %v280_v1, %v36_v17  ;;  %v38_v23 = vld [vmem:[#allocation3 + $0x40] sm:$0xff]  ;;  %v39_v24 = vld [vmem:[#allocation3 + $0x48] sm:$0xff]  ;;  %v388_v50 = vand.u32 127, %v152_v49  ;;  %s271_s29 = sshll.u32 %s336_s2, 4  ;;  %s272_s29 = int_to_ptr.vmem [resolvable:$true] %s271_s29 }
  0x19   :  { %v70_v11 = vsel %vm69_vm0, %v53_v3, 0.0  ;;  %v76_v12 = vsel %vm69_vm0, %v55_v4, 0.0  ;;  %v73_v13 = vsel %vm69_vm0, %v54_v7, 0.0  ;;  %v79_v14 = vsel %vm69_vm0, %v56_v8, 0.0  ;;  %v40_v29 = vld [vmem:[#allocation3 + $0x50] sm:$0xff]  ;;  %v41_v30 = vld [vmem:[#allocation3 + $0x58] sm:$0xff]  ;;  %p312_p9 = scmp.lt.s32.totalorder %s272_s29, %s272_s29 }
  0x1a   :  { %71 = vadd.xlane.f32.xlu0 %v70_v11  ;;  %77 = vadd.xlane.f32.xlu1 %v76_v12  ;;  %v82_v19 = vsel %vm69_vm0, %v57_v15, 0.0  ;;  %v85_v20 = vsel %vm69_vm0, %v58_v16, 0.0  ;;  %v60_v22 = vmul.f32 %v280_v1, %v37_v18  ;;  %v88_v25 = vsel %vm69_vm0, %v59_v21, 0.0  ;;  %v42_v35 = vld [vmem:[#allocation3 + $0x60] sm:$0xff]  ;;  %v43_v36 = vld [vmem:[#allocation3 + $0x68] sm:$0xff]  ;;  %v44_v41 = vld [vmem:[#allocation3 + $0x70] sm:$0xff] }
  0x1b   :  { %v61_v27 = vmul.f32 %v280_v1, %v38_v23  ;;  %v62_v28 = vmul.f32 %v280_v1, %v39_v24  ;;  %v63_v33 = vmul.f32 %v280_v1, %v40_v29  ;;  %v64_v34 = vmul.f32 %v280_v1, %v41_v30  ;;  %v45_v42 = vld [vmem:[#allocation3 + $0x78] sm:$0xff]  ;;  %s307_s30 = scalar_lea.vmem %s272_s29, 16  ;;  %s311_s4 = scalar_lea.vmem %s272_s29, 32 }
  0x1c   :  { %v91_v26 = vsel %vm69_vm0, %v60_v22, 0.0  ;;  %v65_v39 = vmul.f32 %v280_v1, %v42_v35  ;;  %v66_v40 = vmul.f32 %v280_v1, %v43_v36  ;;  %v67_v45 = vmul.f32 %v280_v1, %v44_v41  ;;  %p308_p8 = scmp.ne.s32.totalorder %s272_s29, %s307_s30  ;;  %p313_p10 = scmp.lt.s32.totalorder %s311_s4, %s307_s30 }
  0x1d   :  { %v94_v31 = vsel %vm69_vm0, %v61_v27, 0.0  ;;  %v97_v32 = vsel %vm69_vm0, %v62_v28, 0.0  ;;  %v100_v37 = vsel %vm69_vm0, %v63_v33, 0.0  ;;  %v103_v38 = vsel %vm69_vm0, %v64_v34, 0.0 }
  0x1e   :  { %74 = vadd.xlane.f32.xlu0 %v73_v13  ;;  %80 = vadd.xlane.f32.xlu1 %v79_v14  ;;  %v106_v43 = vsel %vm69_vm0, %v65_v39, 0.0  ;;  %v109_v44 = vsel %vm69_vm0, %v66_v40, 0.0  ;;  %v68_v46 = vmul.f32 %v280_v1, %v45_v42  ;;  %v112_v47 = vsel %vm69_vm0, %v67_v45, 0.0  ;;  %p314_p11 = por %p313_p10, %p312_p9 }
  0x1f   :  { %v390_v51 = vshrl.u32 %v152_v49, 7  ;;  %v158_v52 = vadd.s32 4294967288, %v388_v50  ;;  %v172_v53 = vadd.s32 4294967272, %v388_v50  ;;  %v165_v56 = vadd.s32 4294967280, %v388_v50 }
  0x20   :  { %v115_v48 = vsel %vm69_vm0, %v68_v46, 0.0  ;;  %v179_v58 = vadd.s32 4294967264, %v388_v50  ;;  %v186_v3 = vadd.s32 4294967256, %v388_v50  ;;  %v193_v10 = vadd.s32 4294967248, %v388_v50  ;;  %p315_p12 = pnand %p314_p11, %p308_p8 }
  0x21   :  { %v156_v59 = vsub.s32 %v388_v50, %v390_v51  ;;  %v161_v61 = vsub.s32 %v158_v52, %v390_v51  ;;  %v175_v62 = vsub.s32 %v172_v53, %v390_v51  ;;  %v168_v63 = vsub.s32 %v165_v56, %v390_v51 }
  0x22   :  { %83 = vadd.xlane.f32.xlu0 %v82_v19  ;;  %86 = vadd.xlane.f32.xlu1 %v85_v20  ;;  %v182_v6 = vsub.s32 %v179_v58, %v390_v51  ;;  %v189_v13 = vsub.s32 %v186_v3, %v390_v51  ;;  %v200_v15 = vadd.s32 4294967240, %v388_v50  ;;  %vm184_vm4 = vcmask 326912  }
  0x23   :  { %v196_v22 = vsub.s32 %v193_v10, %v390_v51  ;;  %v207_v23 = vadd.s32 4294967232, %v388_v50  ;;  %v214_v28 = vadd.s32 4294967224, %v388_v50  ;;  %vm191_vm5 = vcmask 392512  }
  0x24   :  { %vm198_vm6 = vcmask 458112   ;;  %v221_v34 = vadd.s32 4294967216, %v388_v50  ;;  %v228_v40 = vadd.s32 4294967208, %v388_v50  ;;  %vm205_vm7 = vcmask 523712  }
  0x25   :  { %v210_v33 = vsub.s32 %v207_v23, %v390_v51  ;;  %vm212_vm8 = vcmask 589312   ;;  %v235_v46 = vadd.s32 4294967200, %v388_v50  ;;  %vm219_vm9 = vcmask 654912  }
  0x26   :  { %89 = vadd.xlane.f32.xlu0 %v88_v25  ;;  %92 = vadd.xlane.f32.xlu1 %v91_v26  ;;  %v203_v26 = vsub.s32 %v200_v15, %v390_v51  ;;  %v224_v45 = vsub.s32 %v221_v34, %v390_v51  ;;  %v231_v52 = vsub.s32 %v228_v40, %v390_v51  ;;  %vm226_vm10 = vcmask 720512  }
  0x27   :  { %vm233_vm11 = vcmask 786112   ;;  %vm240_vm12 = vcmask 851712   ;;  %vm247_vm13 = vcmask 917312   ;;  %vm254_vm14 = vcmask 982912  }
  0x28   :  { %vm261_vm15 = vcmask 1048512  }
  0x2a   :  { %95 = vadd.xlane.f32.xlu0 %v94_v31  ;;  %98 = vadd.xlane.f32.xlu1 %v97_v32 }
  0x2e   :  { %101 = vadd.xlane.f32.xlu0 %v100_v37  ;;  %104 = vadd.xlane.f32.xlu1 %v103_v38  ;;  %v217_v38 = vsub.s32 %v214_v28, %v390_v51 }
  0x32   :  { %107 = vadd.xlane.f32.xlu0 %v106_v43  ;;  %110 = vadd.xlane.f32.xlu1 %v109_v44 }
  0x36   :  { %113 = vadd.xlane.f32.xlu0 %v112_v47  ;;  %116 = vadd.xlane.f32.xlu1 %v115_v48 }
  0xa7   :  { %v72_v55 = vpop.xlane.xlu0 %71  ;;  %v78_v57 = vpop.xlane.xlu1 %77 }
  0xa8   :  { %v120_v60 = vadd.f32 %v397_v54, %v72_v55  ;;  %v122_v0 = vadd.f32 %v397_v54, %v78_v57  ;;  %v242_v55 = vadd.s32 4294967192, %v388_v50 }
  0xaa   :  { %v157_v7 = vrot.slane %v120_v60, %v156_v59  ;;  %v169_v11 = vrot.slane %v122_v0, %v168_v63  ;;  %v238_v60 = vsub.s32 %v235_v46, %v390_v51 }
  0xab   :  { %v75_v1 = vpop.xlane.xlu0 %74  ;;  %v81_v2 = vpop.xlane.xlu1 %80 }
  0xac   :  { %v121_v4 = vadd.f32 %v397_v54, %v75_v1  ;;  %v123_v5 = vadd.f32 %v397_v54, %v81_v2  ;;  %v245_v2 = vsub.s32 %v242_v55, %v390_v51 }
  0xae   :  { %v162_v8 = vrot.slane %v121_v4, %v161_v61  ;;  %v176_v9 = vrot.slane %v123_v5, %v175_v62  ;;  %v249_v61 = vadd.s32 4294967184, %v388_v50  ;;  %v256_v62 = vadd.s32 4294967176, %v388_v50 }
  0xaf   :  { %v84_v12 = vpop.xlane.xlu0 %83  ;;  %v87_v14 = vpop.xlane.xlu1 %86 }
  0xb0   :  { %v164_v16 = vsel %vm163_vm1, %v162_v8, %v157_v7  ;;  %v124_v17 = vadd.f32 %v397_v54, %v84_v12  ;;  %v125_v18 = vadd.f32 %v397_v54, %v87_v14  ;;  %v252_v8 = vsub.s32 %v249_v61, %v390_v51 }
  0xb1   :  { %v171_v19 = vsel %vm170_vm2, %v169_v11, %v164_v16 }
  0xb2   :  { %v178_v20 = vsel %vm177_vm3, %v176_v9, %v171_v19  ;;  %v183_v21 = vrot.slane %v124_v17, %v182_v6  ;;  %v190_v24 = vrot.slane %v125_v18, %v189_v13  ;;  %v259_v9 = vsub.s32 %v256_v62, %v390_v51 }
  0xb3   :  { %v90_v25 = vpop.xlane.xlu0 %89  ;;  %v93_v27 = vpop.xlane.xlu1 %92 }
  0xb4   :  { %v185_v29 = vsel %vm184_vm4, %v183_v21, %v178_v20  ;;  %v126_v30 = vadd.f32 %v397_v54, %v90_v25  ;;  %v127_v31 = vadd.f32 %v397_v54, %v93_v27 }
  0xb5   :  { %v192_v35 = vsel %vm191_vm5, %v190_v24, %v185_v29 }
  0xb6   :  { %v197_v32 = vrot.slane %v126_v30, %v196_v22  ;;  %v204_v36 = vrot.slane %v127_v31, %v203_v26 }
  0xb7   :  { %v96_v37 = vpop.xlane.xlu0 %95  ;;  %v99_v39 = vpop.xlane.xlu1 %98 }
  0xb8   :  { %v199_v41 = vsel %vm198_vm6, %v197_v32, %v192_v35  ;;  %v128_v42 = vadd.f32 %v397_v54, %v96_v37  ;;  %v129_v43 = vadd.f32 %v397_v54, %v99_v39 }
  0xb9   :  { %v206_v47 = vsel %vm205_vm7, %v204_v36, %v199_v41 }
  0xba   :  { %v211_v44 = vrot.slane %v128_v42, %v210_v33  ;;  %v218_v48 = vrot.slane %v129_v43, %v217_v38 }
  0xbb   :  { %v102_v49 = vpop.xlane.xlu0 %101  ;;  %v105_v53 = vpop.xlane.xlu1 %104 }
  0xbc   :  { %v213_v56 = vsel %vm212_vm8, %v211_v44, %v206_v47  ;;  %v130_v57 = vadd.f32 %v397_v54, %v102_v49  ;;  %v131_v58 = vadd.f32 %v397_v54, %v105_v53 }
  0xbd   :  { %v220_v63 = vsel %vm219_vm9, %v218_v48, %v213_v56 }
  0xbe   :  { %v225_v59 = vrot.slane %v130_v57, %v224_v45  ;;  %v232_v0 = vrot.slane %v131_v58, %v231_v52 }
  0xbf   :  { %v108_v1 = vpop.xlane.xlu0 %107  ;;  %v111_v3 = vpop.xlane.xlu1 %110 }
  0xc0   :  { %v227_v4 = vsel %vm226_vm10, %v225_v59, %v220_v63  ;;  %v132_v5 = vadd.f32 %v397_v54, %v108_v1  ;;  %v133_v6 = vadd.f32 %v397_v54, %v111_v3 }
  0xc1   :  { %v234_v10 = vsel %vm233_vm11, %v232_v0, %v227_v4 }
  0xc2   :  { %v239_v7 = vrot.slane %v132_v5, %v238_v60  ;;  %v246_v50 = vrot.slane %v133_v6, %v245_v2 }
  0xc3   :  { %v114_v11 = vpop.xlane.xlu0 %113  ;;  %v117_v12 = vpop.xlane.xlu1 %116 }
  0xc4   :  { %v241_v13 = vsel %vm240_vm12, %v239_v7, %v234_v10  ;;  %v134_v14 = vadd.f32 %v397_v54, %v114_v11  ;;  %v135_v15 = vadd.f32 %v397_v54, %v117_v12 }
  0xc5   :  { %v248_v18 = vsel %vm247_vm13, %v246_v50, %v241_v13 }
  0xc6   :  { %v253_v16 = vrot.slane %v134_v14, %v252_v8  ;;  %v260_v17 = vrot.slane %v135_v15, %v259_v9 }
  0xc8   :  { %v255_v19 = vsel %vm254_vm14, %v253_v16, %v248_v18 }
  0xc9   :  { %v262_v51 = vsel %vm261_vm15, %v260_v17, %v255_v19 }
  0xca   :  { %264 = vst [vmem:[#allocation6] sm:$0x1] %v262_v51 }
  0xcb   :  { %318 = shalt.err (!%p315_p12)
}
  0xcc   :  { %s319_s7 = scalar_lea.hbm %s460_s3, 16 }
  0xcd   :  { %p320_p13 = scmp.ne.s32.totalorder %s460_s3, %s319_s7  ;;  %p323_p0 = scmp.lt.u32.totalorder %s319_s7, %s460_s3 }
  0xcf   :  { %p325_p1 = pnand %p323_p0, %p320_p13 }
  0xd1   :  { %328 = shalt.err (!%p325_p1)
}
  0xd2   :  { %274 = dma.vmem_to_hbm [thread:$0]  %s272_s29, 16, %s460_s3, [#allocation5]  }
  0xd3   :  { %331 = dma.done.wait [#allocation5], 16  }
  0xd4   :  { %332 = vsyncadd [#allocation5], 4294967280 }
  0xd5   :  { %278 = vsyncpa [#allocation4], 1 }
  0xd6   :  { %279 = vsyncpa [#allocation5], 1 }

</bundles_post_ra>
